<compile_context>
chip_gen: v6e
topology: v6e:2x2x1
jax: 0.10.0
libtpu: 0.0.40
codegen_flags: <defaults>
</compile_context>

<pallas_src>
import functools

import jax
import jax.numpy as jnp
from jax import lax
from jax.experimental import pallas as pl
from jax.experimental.pallas import tpu as pltpu


def _sppf_kernel(x_ref, w1_ref, b1_ref, w2_ref, b2_ref, o_ref, *,
                 hidden, h, w, batch, pool_dtype):
    hw = h * w
    bhw = batch * hw

    def silu(v):
        # SiLU = v * sigmoid(v); sigmoid via a single EUP tanh push:
        # sigmoid(v) = 0.5 * tanh(0.5 * v) + 0.5.
        return v * (0.5 * jnp.tanh(0.5 * v) + 0.5)

    def mm(a, b):
        # Inputs arrive pre-cast to the MXU dtype; accumulate in f32.
        return jnp.dot(a, b, preferred_element_type=jnp.float32)

    # ---- cv1: fused 1x1 conv + BN + SiLU  ->  y1: (Ch, B*HW) ---------------
    y1 = silu(mm(w1_ref[...], x_ref[...]) + b1_ref[...]).astype(pool_dtype)

    # ---- boundary masks for the flattened-spatial shifts (built once). -----
    # lane p = img*HW + row*W + col;   q = p % HW keeps shifts inside an image.
    lane = lax.broadcasted_iota(jnp.int32, (hidden, bhw), 1)
    col = (lane & (w - 1)) if (w & (w - 1)) == 0 else (lane % w)
    q = (lane & (hw - 1)) if (hw & (hw - 1)) == 0 else (lane % hw)
    col_mask = {d: (col < (w - d)) if d > 0 else (col >= -d)
                for d in (-2, -1, 1, 2)}
    row_mask = {d: (q < (hw - d * w)) if d > 0 else (q >= -d * w)
                for d in (-2, -1, 1, 2)}

    def shift(v, d):
        # out[p] = v[p + d]  (cyclic over B*HW; callers mask wrapped lanes).
        return pltpu.roll(v, shift=(-d) % bhw, axis=1)

    def maxpool_5x5_same(v):
        # Separable 5x5, stride 1, SAME pad: columns (within rows), then rows.
        acc = v
        for d in (-2, -1, 1, 2):
            acc = jnp.where(col_mask[d], jnp.maximum(acc, shift(v, d)), acc)
        out = acc
        for d in (-2, -1, 1, 2):
            out = jnp.where(row_mask[d], jnp.maximum(out, shift(acc, d * w)), out)
        return out

    y2 = maxpool_5x5_same(y1)
    y3 = maxpool_5x5_same(y2)
    y4 = maxpool_5x5_same(y3)

    # ---- cv2: fused 1x1 conv + BN + SiLU over the [y1..y4] channel concat. -
    # Sublane-stack the four (Ch, B*HW) blocks -> ONE (Cout, 4*Ch) matmul.
    ycat = jnp.concatenate([y1, y2, y3, y4], axis=0)          # (4*Ch, B*HW)
    pre = mm(w2_ref[...], ycat) + b2_ref[...]
    o_ref[...] = silu(pre).astype(o_ref.dtype)


def sppf_pallas(x_nchw, w1, b1, w2, b2, *,
                mxu_dtype=jnp.bfloat16, pool_dtype=None):
    """SPPF forward (eval mode, BN folded).

    x_nchw: (B, Cin, H, W) float32.
    w1: (Ch, Cin),   b1: (Ch,)      -- cv1 conv weight / bias with BN folded.
    w2: (Cout, 4*Ch), b2: (Cout,)   -- cv2 conv weight / bias with BN folded.
    pool_dtype: dtype of the max-pool cascade (defaults to mxu_dtype).
                Use jnp.float32 on v5e (no bf16 VALU).
    """
    B, Cin, H, W = x_nchw.shape
    Ch = w1.shape[0]
    Cout = w2.shape[0]
    HW = H * W
    BHW = B * HW
    if pool_dtype is None:
        pool_dtype = mxu_dtype
    # Note: if BHW is not a multiple of 128 the kernel stays correct but output
    # stores become masked (vst.msk) — keep BHW lane-dense when possible.

    # Glue: fold batch into the lane axis -> (Cin, B*HW); pre-cast MXU inputs.
    x2 = jnp.transpose(x_nchw.reshape(B, Cin, HW), (1, 0, 2)).reshape(Cin, BHW)
    x2 = x2.astype(mxu_dtype)
    w1c = w1.astype(mxu_dtype)
    w2c = w2.astype(mxu_dtype)
    b1c = b1.reshape(Ch, 1).astype(jnp.float32)
    b2c = b2.reshape(Cout, 1).astype(jnp.float32)

    kernel = functools.partial(
        _sppf_kernel, hidden=Ch, h=H, w=W, batch=B, pool_dtype=pool_dtype)

    vmem_spec = pl.BlockSpec(memory_space=pltpu.MemorySpace.VMEM)
    out2 = pl.pallas_call(
        kernel,
        out_shape=jax.ShapeDtypeStruct((Cout, BHW), x_nchw.dtype),
        in_specs=[vmem_spec] * 5,
        out_specs=vmem_spec,
    )(x2, w1c, b1c, w2c, b2c)

    out = jnp.transpose(out2.reshape(Cout, B, HW), (1, 0, 2))
    return out.reshape(B, Cout, H, W)


# ---------------- pure-JAX reference (for correctness check) ----------------
def sppf_reference(x_nchw, w1, b1, w2, b2):
    x = jnp.transpose(x_nchw, (0, 2, 3, 1))                      # NHWC
    y1 = jax.nn.silu(jnp.einsum("bhwc,dc->bhwd", x, w1) + b1)

    def mp(y):
        return lax.reduce_window(y, -jnp.inf, lax.max,
                                 (1, 5, 5, 1), (1, 1, 1, 1), "SAME")

    y2 = mp(y1); y3 = mp(y2); y4 = mp(y3)
    cat = jnp.concatenate([y1, y2, y3, y4], axis=-1)
    out = jax.nn.silu(jnp.einsum("bhwc,dc->bhwd", cat, w2) + b2)
    return jnp.transpose(out, (0, 3, 1, 2))


if __name__ == "__main__":
    # SPPF(in_channels=16, out_channels=16) on input (B=2, C=16, H=16, W=16)
    B, Cin, H, W = 2, 16, 16, 16
    Cout = 16
    Ch = Cin // 2                                   # hidden_channels

    key = jax.random.PRNGKey(0)
    ks = jax.random.split(key, 11)

    x = jax.random.normal(ks[0], (B, Cin, H, W), jnp.float32)

    eps = 1e-5

    def fold_bn(conv_w, k_gamma, k_beta, k_mean, k_var):
        """General eval-mode BN fold (non-zero running_mean, non-unit var)."""
        cout = conv_w.shape[0]
        gamma = 1.0 + 0.1 * jax.random.normal(k_gamma, (cout,), jnp.float32)
        beta = 0.1 * jax.random.normal(k_beta, (cout,), jnp.float32)
        mean = 0.1 * jax.random.normal(k_mean, (cout,), jnp.float32)
        var = 1.0 + 0.2 * jax.random.uniform(k_var, (cout,), jnp.float32)
        scale = gamma / jnp.sqrt(var + eps)
        return conv_w * scale[:, None], beta - mean * scale

    conv1_w = 0.1 * jax.random.normal(ks[1], (Ch, Cin), jnp.float32)
    w1, b1 = fold_bn(conv1_w, ks[2], ks[3], ks[4], ks[5])
    conv2_w = 0.1 * jax.random.normal(ks[6], (Cout, 4 * Ch), jnp.float32)
    w2, b2 = fold_bn(conv2_w, ks[7], ks[8], ks[9], ks[10])

    ref = jax.block_until_ready(sppf_reference(x, w1, b1, w2, b2))

    # 1) f32-MXU / f32-pool mode: tight structural/numerical check.
    out_f32 = jax.block_until_ready(
        sppf_pallas(x, w1, b1, w2, b2,
                    mxu_dtype=jnp.float32, pool_dtype=jnp.float32))
    assert out_f32.shape == (B, Cout, H, W), out_f32.shape
    assert jnp.allclose(out_f32, ref, atol=1e-4, rtol=1e-4), float(
        jnp.max(jnp.abs(out_f32 - ref)))

    # 2) default bf16-MXU / bf16-pool mode (peak-throughput path on v6e/v7x):
    #    loose check against the f32 reference.
    out_bf16 = jax.block_until_ready(sppf_pallas(x, w1, b1, w2, b2))
    assert out_bf16.shape == (B, Cout, H, W), out_bf16.shape
    assert jnp.allclose(out_bf16, ref, atol=5e-2, rtol=5e-2), float(
        jnp.max(jnp.abs(out_bf16 - ref)))

    print("KERNEL_OK")
</pallas_src>

<mosaic_0001>
module attributes {stable_mosaic.version = 11 : i64} {
  func.func @_sppf_kernel(%arg0: memref<16x512xf32, #tpu.memory_space<vmem>>, %arg1: memref<8x16xf32, #tpu.memory_space<vmem>>, %arg2: memref<8x1xf32, #tpu.memory_space<vmem>>, %arg3: memref<16x32xf32, #tpu.memory_space<vmem>>, %arg4: memref<16x1xf32, #tpu.memory_space<vmem>>, %arg5: memref<16x512xf32, #tpu.memory_space<vmem>>) attributes {dimension_semantics = [], scalar_prefetch = 0 : i64, scratch_operands = 0 : i64, tpu.core_type = #tpu.core_type<tc>} {
    %c0 = arith.constant 0 : index
    %c0_0 = arith.constant 0 : index
    %0 = vector.load %arg1[%c0, %c0_0] : memref<8x16xf32, #tpu.memory_space<vmem>>, vector<8x16xf32>
    %c0_1 = arith.constant 0 : index
    %c0_2 = arith.constant 0 : index
    %1 = vector.load %arg0[%c0_1, %c0_2] : memref<16x512xf32, #tpu.memory_space<vmem>>, vector<16x512xf32>
    %cst = arith.constant dense<0.000000e+00> : vector<8x512xf32>
    %2 = tpu.matmul %0, %1, %cst {dimension_numbers = #tpu.dot_dimension_numbers<[1], [0], [0], [1], [0, 0, 1, 1], [], []>} : vector<8x16xf32>, vector<16x512xf32>, vector<8x512xf32> -> vector<8x512xf32>
    %c0_3 = arith.constant 0 : index
    %c0_4 = arith.constant 0 : index
    %3 = vector.load %arg2[%c0_3, %c0_4] : memref<8x1xf32, #tpu.memory_space<vmem>>, vector<8x1xf32>
    %4 = vector.broadcast %3 : vector<8x1xf32> to vector<8x512xf32>
    %5 = arith.addf %2, %4 : vector<8x512xf32>
    %cst_5 = arith.constant 5.000000e-01 : f32
    %6 = vector.broadcast %cst_5 : f32 to vector<8x512xf32>
    %7 = arith.mulf %6, %5 : vector<8x512xf32>
    %8 = math.tanh %7 : vector<8x512xf32>
    %cst_6 = arith.constant 5.000000e-01 : f32
    %9 = vector.broadcast %cst_6 : f32 to vector<8x512xf32>
    %10 = arith.mulf %9, %8 : vector<8x512xf32>
    %cst_7 = arith.constant 5.000000e-01 : f32
    %11 = vector.broadcast %cst_7 : f32 to vector<8x512xf32>
    %12 = arith.addf %10, %11 : vector<8x512xf32>
    %13 = arith.mulf %5, %12 : vector<8x512xf32>
    %14 = tpu.iota {dimensions = array<i32: 1>} : vector<8x512xi32>
    %c15_i32 = arith.constant 15 : i32
    %15 = vector.broadcast %c15_i32 : i32 to vector<8x512xi32>
    %16 = arith.andi %14, %15 : vector<8x512xi32>
    %c255_i32 = arith.constant 255 : i32
    %17 = vector.broadcast %c255_i32 : i32 to vector<8x512xi32>
    %18 = arith.andi %14, %17 : vector<8x512xi32>
    %c2_i32 = arith.constant 2 : i32
    %19 = vector.broadcast %c2_i32 : i32 to vector<8x512xi32>
    %20 = arith.cmpi sge, %16, %19 : vector<8x512xi32>
    %c1_i32 = arith.constant 1 : i32
    %21 = vector.broadcast %c1_i32 : i32 to vector<8x512xi32>
    %22 = arith.cmpi sge, %16, %21 : vector<8x512xi32>
    %c15_i32_8 = arith.constant 15 : i32
    %23 = vector.broadcast %c15_i32_8 : i32 to vector<8x512xi32>
    %24 = arith.cmpi slt, %16, %23 : vector<8x512xi32>
    %c14_i32 = arith.constant 14 : i32
    %25 = vector.broadcast %c14_i32 : i32 to vector<8x512xi32>
    %26 = arith.cmpi slt, %16, %25 : vector<8x512xi32>
    %c32_i32 = arith.constant 32 : i32
    %27 = vector.broadcast %c32_i32 : i32 to vector<8x512xi32>
    %28 = arith.cmpi sge, %18, %27 : vector<8x512xi32>
    %c16_i32 = arith.constant 16 : i32
    %29 = vector.broadcast %c16_i32 : i32 to vector<8x512xi32>
    %30 = arith.cmpi sge, %18, %29 : vector<8x512xi32>
    %c240_i32 = arith.constant 240 : i32
    %31 = vector.broadcast %c240_i32 : i32 to vector<8x512xi32>
    %32 = arith.cmpi slt, %18, %31 : vector<8x512xi32>
    %c224_i32 = arith.constant 224 : i32
    %33 = vector.broadcast %c224_i32 : i32 to vector<8x512xi32>
    %34 = arith.cmpi slt, %18, %33 : vector<8x512xi32>
    %c2_i32_9 = arith.constant 2 : i32
    %35 = tpu.dynamic_rotate %13 by %c2_i32_9 dim 1 : vector<8x512xf32>, i32 -> vector<8x512xf32>
    %36 = arith.maximumf %13, %35 : vector<8x512xf32>
    %37 = arith.select %20, %36, %13 : vector<8x512xi1>, vector<8x512xf32>
    %c1_i32_10 = arith.constant 1 : i32
    %38 = tpu.dynamic_rotate %13 by %c1_i32_10 dim 1 : vector<8x512xf32>, i32 -> vector<8x512xf32>
    %39 = arith.maximumf %37, %38 : vector<8x512xf32>
    %40 = arith.select %22, %39, %37 : vector<8x512xi1>, vector<8x512xf32>
    %c511_i32 = arith.constant 511 : i32
    %41 = tpu.dynamic_rotate %13 by %c511_i32 dim 1 : vector<8x512xf32>, i32 -> vector<8x512xf32>
    %42 = arith.maximumf %40, %41 : vector<8x512xf32>
    %43 = arith.select %24, %42, %40 : vector<8x512xi1>, vector<8x512xf32>
    %c510_i32 = arith.constant 510 : i32
    %44 = tpu.dynamic_rotate %13 by %c510_i32 dim 1 : vector<8x512xf32>, i32 -> vector<8x512xf32>
    %45 = arith.maximumf %43, %44 : vector<8x512xf32>
    %46 = arith.select %26, %45, %43 : vector<8x512xi1>, vector<8x512xf32>
    %c32_i32_11 = arith.constant 32 : i32
    %47 = tpu.dynamic_rotate %46 by %c32_i32_11 dim 1 : vector<8x512xf32>, i32 -> vector<8x512xf32>
    %48 = arith.maximumf %46, %47 : vector<8x512xf32>
    %49 = arith.select %28, %48, %46 : vector<8x512xi1>, vector<8x512xf32>
    %c16_i32_12 = arith.constant 16 : i32
    %50 = tpu.dynamic_rotate %46 by %c16_i32_12 dim 1 : vector<8x512xf32>, i32 -> vector<8x512xf32>
    %51 = arith.maximumf %49, %50 : vector<8x512xf32>
    %52 = arith.select %30, %51, %49 : vector<8x512xi1>, vector<8x512xf32>
    %c496_i32 = arith.constant 496 : i32
    %53 = tpu.dynamic_rotate %46 by %c496_i32 dim 1 : vector<8x512xf32>, i32 -> vector<8x512xf32>
    %54 = arith.maximumf %52, %53 : vector<8x512xf32>
    %55 = arith.select %32, %54, %52 : vector<8x512xi1>, vector<8x512xf32>
    %c480_i32 = arith.constant 480 : i32
    %56 = tpu.dynamic_rotate %46 by %c480_i32 dim 1 : vector<8x512xf32>, i32 -> vector<8x512xf32>
    %57 = arith.maximumf %55, %56 : vector<8x512xf32>
    %58 = arith.select %34, %57, %55 : vector<8x512xi1>, vector<8x512xf32>
    %c2_i32_13 = arith.constant 2 : i32
    %59 = tpu.dynamic_rotate %58 by %c2_i32_13 dim 1 : vector<8x512xf32>, i32 -> vector<8x512xf32>
    %60 = arith.maximumf %58, %59 : vector<8x512xf32>
    %61 = arith.select %20, %60, %58 : vector<8x512xi1>, vector<8x512xf32>
    %c1_i32_14 = arith.constant 1 : i32
    %62 = tpu.dynamic_rotate %58 by %c1_i32_14 dim 1 : vector<8x512xf32>, i32 -> vector<8x512xf32>
    %63 = arith.maximumf %61, %62 : vector<8x512xf32>
    %64 = arith.select %22, %63, %61 : vector<8x512xi1>, vector<8x512xf32>
    %c511_i32_15 = arith.constant 511 : i32
    %65 = tpu.dynamic_rotate %58 by %c511_i32_15 dim 1 : vector<8x512xf32>, i32 -> vector<8x512xf32>
    %66 = arith.maximumf %64, %65 : vector<8x512xf32>
    %67 = arith.select %24, %66, %64 : vector<8x512xi1>, vector<8x512xf32>
    %c510_i32_16 = arith.constant 510 : i32
    %68 = tpu.dynamic_rotate %58 by %c510_i32_16 dim 1 : vector<8x512xf32>, i32 -> vector<8x512xf32>
    %69 = arith.maximumf %67, %68 : vector<8x512xf32>
    %70 = arith.select %26, %69, %67 : vector<8x512xi1>, vector<8x512xf32>
    %c32_i32_17 = arith.constant 32 : i32
    %71 = tpu.dynamic_rotate %70 by %c32_i32_17 dim 1 : vector<8x512xf32>, i32 -> vector<8x512xf32>
    %72 = arith.maximumf %70, %71 : vector<8x512xf32>
    %73 = arith.select %28, %72, %70 : vector<8x512xi1>, vector<8x512xf32>
    %c16_i32_18 = arith.constant 16 : i32
    %74 = tpu.dynamic_rotate %70 by %c16_i32_18 dim 1 : vector<8x512xf32>, i32 -> vector<8x512xf32>
    %75 = arith.maximumf %73, %74 : vector<8x512xf32>
    %76 = arith.select %30, %75, %73 : vector<8x512xi1>, vector<8x512xf32>
    %c496_i32_19 = arith.constant 496 : i32
    %77 = tpu.dynamic_rotate %70 by %c496_i32_19 dim 1 : vector<8x512xf32>, i32 -> vector<8x512xf32>
    %78 = arith.maximumf %76, %77 : vector<8x512xf32>
    %79 = arith.select %32, %78, %76 : vector<8x512xi1>, vector<8x512xf32>
    %c480_i32_20 = arith.constant 480 : i32
    %80 = tpu.dynamic_rotate %70 by %c480_i32_20 dim 1 : vector<8x512xf32>, i32 -> vector<8x512xf32>
    %81 = arith.maximumf %79, %80 : vector<8x512xf32>
    %82 = arith.select %34, %81, %79 : vector<8x512xi1>, vector<8x512xf32>
    %c2_i32_21 = arith.constant 2 : i32
    %83 = tpu.dynamic_rotate %82 by %c2_i32_21 dim 1 : vector<8x512xf32>, i32 -> vector<8x512xf32>
    %84 = arith.maximumf %82, %83 : vector<8x512xf32>
    %85 = arith.select %20, %84, %82 : vector<8x512xi1>, vector<8x512xf32>
    %c1_i32_22 = arith.constant 1 : i32
    %86 = tpu.dynamic_rotate %82 by %c1_i32_22 dim 1 : vector<8x512xf32>, i32 -> vector<8x512xf32>
    %87 = arith.maximumf %85, %86 : vector<8x512xf32>
    %88 = arith.select %22, %87, %85 : vector<8x512xi1>, vector<8x512xf32>
    %c511_i32_23 = arith.constant 511 : i32
    %89 = tpu.dynamic_rotate %82 by %c511_i32_23 dim 1 : vector<8x512xf32>, i32 -> vector<8x512xf32>
    %90 = arith.maximumf %88, %89 : vector<8x512xf32>
    %91 = arith.select %24, %90, %88 : vector<8x512xi1>, vector<8x512xf32>
    %c510_i32_24 = arith.constant 510 : i32
    %92 = tpu.dynamic_rotate %82 by %c510_i32_24 dim 1 : vector<8x512xf32>, i32 -> vector<8x512xf32>
    %93 = arith.maximumf %91, %92 : vector<8x512xf32>
    %94 = arith.select %26, %93, %91 : vector<8x512xi1>, vector<8x512xf32>
    %c32_i32_25 = arith.constant 32 : i32
    %95 = tpu.dynamic_rotate %94 by %c32_i32_25 dim 1 : vector<8x512xf32>, i32 -> vector<8x512xf32>
    %96 = arith.maximumf %94, %95 : vector<8x512xf32>
    %97 = arith.select %28, %96, %94 : vector<8x512xi1>, vector<8x512xf32>
    %c16_i32_26 = arith.constant 16 : i32
    %98 = tpu.dynamic_rotate %94 by %c16_i32_26 dim 1 : vector<8x512xf32>, i32 -> vector<8x512xf32>
    %99 = arith.maximumf %97, %98 : vector<8x512xf32>
    %100 = arith.select %30, %99, %97 : vector<8x512xi1>, vector<8x512xf32>
    %c496_i32_27 = arith.constant 496 : i32
    %101 = tpu.dynamic_rotate %94 by %c496_i32_27 dim 1 : vector<8x512xf32>, i32 -> vector<8x512xf32>
    %102 = arith.maximumf %100, %101 : vector<8x512xf32>
    %103 = arith.select %32, %102, %100 : vector<8x512xi1>, vector<8x512xf32>
    %c480_i32_28 = arith.constant 480 : i32
    %104 = tpu.dynamic_rotate %94 by %c480_i32_28 dim 1 : vector<8x512xf32>, i32 -> vector<8x512xf32>
    %105 = arith.maximumf %103, %104 : vector<8x512xf32>
    %106 = arith.select %34, %105, %103 : vector<8x512xi1>, vector<8x512xf32>
    %107 = tpu.concatenate %13, %58, %82, %106 in 0 : vector<8x512xf32>, vector<8x512xf32>, vector<8x512xf32>, vector<8x512xf32> -> vector<32x512xf32>
    %c0_29 = arith.constant 0 : index
    %c0_30 = arith.constant 0 : index
    %108 = vector.load %arg3[%c0_29, %c0_30] : memref<16x32xf32, #tpu.memory_space<vmem>>, vector<16x32xf32>
    %cst_31 = arith.constant dense<0.000000e+00> : vector<16x512xf32>
    %109 = tpu.matmul %108, %107, %cst_31 {dimension_numbers = #tpu.dot_dimension_numbers<[1], [0], [0], [1], [0, 0, 1, 1], [], []>} : vector<16x32xf32>, vector<32x512xf32>, vector<16x512xf32> -> vector<16x512xf32>
    %c0_32 = arith.constant 0 : index
    %c0_33 = arith.constant 0 : index
    %110 = vector.load %arg4[%c0_32, %c0_33] : memref<16x1xf32, #tpu.memory_space<vmem>>, vector<16x1xf32>
    %111 = vector.broadcast %110 : vector<16x1xf32> to vector<16x512xf32>
    %112 = arith.addf %109, %111 : vector<16x512xf32>
    %cst_34 = arith.constant 5.000000e-01 : f32
    %113 = vector.broadcast %cst_34 : f32 to vector<16x512xf32>
    %114 = arith.mulf %113, %112 : vector<16x512xf32>
    %115 = math.tanh %114 : vector<16x512xf32>
    %cst_35 = arith.constant 5.000000e-01 : f32
    %116 = vector.broadcast %cst_35 : f32 to vector<16x512xf32>
    %117 = arith.mulf %116, %115 : vector<16x512xf32>
    %cst_36 = arith.constant 5.000000e-01 : f32
    %118 = vector.broadcast %cst_36 : f32 to vector<16x512xf32>
    %119 = arith.addf %117, %118 : vector<16x512xf32>
    %120 = arith.mulf %112, %119 : vector<16x512xf32>
    %c0_37 = arith.constant 0 : index
    %c0_38 = arith.constant 0 : index
    %121 = vector.load %arg5[%c0_37, %c0_38] : memref<16x512xf32, #tpu.memory_space<vmem>>, vector<16x512xf32>
    tpu.vector_store %arg5[%c0_37, %c0_38], %120 {strides = array<i32>} : memref<16x512xf32, #tpu.memory_space<vmem>>, vector<16x512xf32>,
    return
  }
}

</mosaic_0001>

<bundles_post_ra>
// kernel: tpu_custom_call.1
= control target key start
LH: loop header
LB: loop body
LE: loop exit
PB: predicated region body
PF: predicated region fallthrough
CT: control target
= control target key end

     0   :  { %10 = vsyncpa [#allocation3], 0  ;;  %s1795_s0 = inlined_call_operand.hbm [shape: f32[16,512], index: 0, kind: input, shape index: {}]   ;;  %s1796_s1 = inlined_call_operand.vmem [shape: f32[8,16], index: 1, kind: input, shape index: {}]   ;;  %s1797_s2 = inlined_call_operand.vmem [shape: f32[8,1], index: 2, kind: input, shape index: {}]   ;;  %s1798_s3 = inlined_call_operand.vmem [shape: f32[16,32], index: 3, kind: input, shape index: {}]   ;;  %s1799_s4 = inlined_call_operand.vmem [shape: f32[16,1], index: 4, kind: input, shape index: {}]   ;;  %s1800_s5 = inlined_call_operand.hbm [shape: f32[16,512], index: 5, kind: output, shape index: {}]  }
   0x1   :  { %11 = vsyncpa [#allocation4], 0  ;;  %s1078_s18 = smov [#allocation2]  }
   0x2   :  { %s17_s19 = sshll.u32 %s1078_s18, 4  ;;  %s18_s19 = int_to_ptr.vmem [resolvable:$true] %s17_s19 }
   0x3   :  { %s1042_s20 = scalar_lea.vmem %s18_s19, 1024  ;;  %p1047_p1 = scmp.lt.s32.totalorder %s18_s19, %s18_s19 }
   0x4   :  { %p1043_p0 = scmp.ne.s32.totalorder %s18_s19, %s1042_s20  ;;  %p1048_p2 = scmp.lt.s32.totalorder %s1042_s20, %s1042_s20 }
   0x6   :  { %p1049_p3 = por %p1048_p2, %p1047_p1 }
   0x8   :  { %p1050_p4 = pnand %p1049_p3, %p1043_p0 }
   0xa   :  { %1053 = shalt.err (!%p1050_p4)
}
   0xb   :  { %s1079_s21 = smov 512   ;;  %s1080_s22 = smov 32  }
   0xc   :  { %23 = dma.hbm_to_vmem [thread:$0]  %s1795_s0, 1024, %s18_s19, [#allocation3], %s1079_s21, %s1079_s21, %s1080_s22  }
   0xd   :  { %1074 = dma.done.wait [#allocation3], 1024  }
   0xe   :  { %1075 = vsyncadd [#allocation3], 4294966272  ;;  %v1081_v0 = vmov 0.0   ;;  %v1082_v1 = vmov 0   ;;  %v41_v2 = vld [vmem:[#allocation2 + $0x28] sm:$0xff]  ;;  %v43_v3 = vld [vmem:[#allocation2 + $0x38] sm:$0xff]  ;;  %v216_v41 = vlaneseq }
   0xf   :  { %118 = vmatprep.mubr.f32.mxu0 %v1081_v0  ;;  %189 = vmatprep.mubr.f32.mxu1 %v1081_v0  ;;  %v40_v4 = vld [vmem:[#allocation2 + $0x20] sm:$0xff]  ;;  %v42_v5 = vld [vmem:[#allocation2 + $0x30] sm:$0xff]  ;;  %v37_v6 = vld [vmem:[#allocation2 + $0x8] sm:$0xff]  ;;  %vm50_vm0 = vcmask 130048   ;;  %s1085_s28 = smov 127   ;;  %s1086_s29 = smov 126  }
  0x10   :  { %1008 = vset.pattern.permute.xlu0 %v1082_v1  ;;  %1009 = vset.pattern.permute.xlu1 %v1082_v1  ;;  %v39_v7 = vld [vmem:[#allocation2 + $0x18] sm:$0xff]  ;;  %v36_v8 = vld [vmem:[#allocation2] sm:$0xff]  ;;  %v38_v9 = vld [vmem:[#allocation2 + $0x10] sm:$0xff]  ;;  %v1177_v43 = vand.u32 127, %v216_v41  ;;  %s1087_s30 = smov 16   ;;  %s1088_s6 = smov 112  }
  0x11   :  { %82 = vmatprep.subr.mxu0 %v41_v2  ;;  %153 = vmatprep.subr.mxu1 %v43_v3  ;;  %v35_v10 = vld [vmem:[%s1796_s1] sm:$0xff]  ;;  %s1083_s1 = smov 2   ;;  %s1089_s7 = smov 96  }
  0x12   :  { %83 = vmatpush1.msra.mxu0 %v40_v4  ;;  %154 = vmatpush1.msra.mxu1 %v42_v5  ;;  %v44_v11 = vld [vmem:[%s1797_s2] sm:$0xff]  ;;  %s1084_s2 = smov 1   ;;  %vm269_vm1 = vcmp.lt.s32.totalorder %v1177_v43, 2  ;;  %v1183_v48 = vand.u32 15, %v1177_v43  ;;  %v1186_v51 = vadd.s32 384, %v1177_v43  ;;  %v1189_v52 = vadd.s32 128, %v1177_v43 }
  0x13   :  { %84 = vmatprep.subr.mxu0 %v37_v6  ;;  %155 = vmatprep.subr.mxu1 %v39_v7  ;;  %v1193_v54 = vadd.s32 256, %v1177_v43  ;;  %vm1821_vm3 = vcmp.lt.s32.totalorder %v1177_v43, 1  ;;  %vm1822_vm5 = vcmp.lt.s32.totalorder %v1177_v43, 127  ;;  %vm1813_vm12 = vcmp.lt.s32.totalorder %v1177_v43, 126 }
  0x14   :  { %85 = vmatpush1.msra.mxu0 %v36_v8  ;;  %156 = vmatpush1.msra.mxu1 %v38_v9  ;;  %vm1817_vm2 = vcmp.ge.s32.totalorder %v1183_v48, 2  ;;  %v1198_v57 = vand.u32 15, %v1186_v51  ;;  %v1203_v59 = vand.u32 15, %v1189_v52  ;;  %vm1818_vm4 = vcmp.ge.s32.totalorder %v1183_v48, 1 }
  0x15   :  { %989 = vmatmul.mubr.msk.f32.vlgmr.msra.gmra.mxu0 %vm50_vm0, %v35_v10  ;;  %990 = vmatmul.mubr.msk.f32.vlgmr.msra.gmra.mxu1 %vm50_vm0, %v35_v10  ;;  %v1209_v61 = vand.u32 15, %v1193_v54  ;;  %vm1802_vm11 = vcmp.lt.s32.totalorder %v1183_v48, 15  ;;  %vm1810_vm14 = vcmp.lt.s32.totalorder %v1183_v48, 14 }
  0x16   :  { %47 = vperm.xlu0 %1008, %v44_v11   ;;  %834 = vmatprep.mubr.f32.mxu0 %v1081_v0  ;;  %vm1815_vm6 = vcmp.ge.s32.totalorder %v1198_v57, 2  ;;  %vm1820_vm7 = vcmp.ge.s32.totalorder %v1203_v59, 2  ;;  %vm1803_vm9 = vcmp.ge.s32.totalorder %v1203_v59, 1  ;;  %vm1814_vm13 = vcmp.ge.s32.totalorder %v1198_v57, 1 }
  0x17   :  { %911 = vmatprep.mubr.f32.mxu1 %v1081_v0  ;;  %vm1819_vm8 = vcmp.ge.s32.totalorder %v1209_v61, 2  ;;  %vm1801_vm10 = vcmp.ge.s32.totalorder %v1209_v61, 1  ;;  %vm1809_vm15 = vcmp.lt.s32.totalorder %v1203_v59, 15  ;;  %vm1804_vm0 = vcmp.lt.s32.totalorder %v1209_v61, 15 }
  0x91   :  { %v48_v12 = vpop.permute.xlu0 %47 }
  0xd5   :  { %v120_v13 = vpop.f32.mrf.mxu0  ;;  %v191_v14 = vpop.f32.mrf.mxu1 }
  0xd6   :  { %v121_v15 = vadd.f32 %v120_v13, %v48_v12  ;;  %v192_v16 = vadd.f32 %v191_v14, %v48_v12 }
  0xd7   :  { %v122_v17 = vpop.f32.mrf.mxu0  ;;  %v193_v18 = vpop.f32.mrf.mxu1 }
  0xd8   :  { %v196_v19 = vmul.f32 0.5, %v121_v15  ;;  %v198_v20 = vmul.f32 0.5, %v192_v16  ;;  %v123_v21 = vadd.f32 %v122_v17, %v48_v12  ;;  %v194_v22 = vadd.f32 %v193_v18, %v48_v12 }
  0xda   :  { %1010 = vtanh.f32 %v196_v19  ;;  %v197_v23 = vmul.f32 0.5, %v123_v21  ;;  %v199_v24 = vmul.f32 0.5, %v194_v22 }
  0xdb   :  { %1012 = vtanh.f32 %v198_v20 }
  0xdc   :  { %1014 = vtanh.f32 %v197_v23 }
  0xdd   :  { %1016 = vtanh.f32 %v199_v24 }
  0xe7   :  { %v1011_v25 = vpop.eup %1010 }
  0xe8   :  { %v1013_v26 = vpop.eup %1012  ;;  %v204_v27 = vmul.f32 0.5, %v1011_v25 }
  0xe9   :  { %v1015_v28 = vpop.eup %1014  ;;  %v206_v29 = vmul.f32 0.5, %v1013_v26 }
  0xea   :  { %v1017_v30 = vpop.eup %1016  ;;  %v208_v31 = vadd.f32 0.5, %v204_v27  ;;  %v205_v35 = vmul.f32 0.5, %v1015_v28 }
  0xeb   :  { %v210_v32 = vadd.f32 0.5, %v206_v29  ;;  %v207_v33 = vmul.f32 0.5, %v1017_v30 }
  0xec   :  { %v1137_v34 = vmul.f32 %v208_v31, %v121_v15  ;;  %v209_v38 = vadd.f32 0.5, %v205_v35 }
  0xed   :  { %v1139_v36 = vmul.f32 %v210_v32, %v192_v16  ;;  %v211_v37 = vadd.f32 0.5, %v207_v33 }
  0xee   :  { %261 = vrot.lane.b32.xlu0 %v1137_v34, %s1083_s1  ;;  %v1151_v40 = vmul.f32 %v209_v38, %v123_v21 }
  0xef   :  { %265 = vrot.lane.b32.xlu1 %v1139_v36, %s1083_s1  ;;  %v1145_v39 = vmul.f32 %v211_v37, %v194_v22 }
  0xf2   :  { %267 = vrot.lane.b32.xlu0 %v1145_v39, %s1083_s1 }
  0xf3   :  { %282 = vrot.lane.b32.xlu1 %v1137_v34, %s1084_s2 }
  0xf6   :  { %284 = vrot.lane.b32.xlu0 %v1151_v40, %s1084_s2 }
  0xf7   :  { %286 = vrot.lane.b32.xlu1 %v1139_v36, %s1084_s2 }
  0xfa   :  { %288 = vrot.lane.b32.xlu0 %v1145_v39, %s1084_s2 }
  0xfb   :  { %303 = vrot.lane.b32.xlu1 %v1137_v34, %s1085_s28 }
  0xfe   :  { %305 = vrot.lane.b32.xlu0 %v1151_v40, %s1085_s28 }
  0xff   :  { %263 = vrot.lane.b32.xlu1 %v1151_v40, %s1083_s1 }
 0x102   :  { %309 = vrot.lane.b32.xlu0 %v1145_v39, %s1085_s28 }
 0x103   :  { %307 = vrot.lane.b32.xlu1 %v1139_v36, %s1085_s28 }
 0x106   :  { %326 = vrot.lane.b32.xlu0 %v1151_v40, %s1086_s29 }
 0x107   :  { %324 = vrot.lane.b32.xlu1 %v1137_v34, %s1086_s29 }
 0x10a   :  { %330 = vrot.lane.b32.xlu0 %v1145_v39, %s1086_s29 }
 0x10b   :  { %328 = vrot.lane.b32.xlu1 %v1139_v36, %s1086_s29 }
 0x160   :  { %v262_v42 = vpop.permute.xlu0 %261 }
 0x161   :  { %v266_v44 = vpop.permute.xlu1 %265 }
 0x164   :  { %v268_v45 = vpop.permute.xlu0 %267 }
 0x165   :  { %v283_v46 = vpop.permute.xlu1 %282  ;;  %v273_v47 = vsel %vm269_vm1, %v268_v45, %v262_v42  ;;  %v270_v62 = vsel %vm269_vm1, %v266_v44, %v268_v45 }
 0x166   :  { %v274_v53 = vmax.f32 %v1137_v34, %v273_v47  ;;  %v277_v3 = vmax.f32 %v1145_v39, %v270_v62 }
 0x168   :  { %v285_v49 = vpop.permute.xlu0 %284  ;;  %v278_v60 = vsel %vm1817_vm2, %v274_v53, %v1137_v34  ;;  %v281_v17 = vsel %vm1815_vm6, %v277_v3, %v1145_v39 }
 0x169   :  { %v287_v50 = vpop.permute.xlu1 %286  ;;  %v293_v13 = vsel %vm1821_vm3, %v283_v46, %v285_v49 }
 0x16a   :  { %v292_v12 = vsel %vm1821_vm3, %v285_v49, %v287_v50 }
 0x16c   :  { %v289_v55 = vpop.permute.xlu0 %288 }
 0x16d   :  { %v304_v56 = vpop.permute.xlu1 %303  ;;  %v294_v58 = vsel %vm1821_vm3, %v289_v55, %v283_v46  ;;  %v291_v10 = vsel %vm1821_vm3, %v287_v50, %v289_v55 }
 0x16e   :  { %v295_v63 = vmax.f32 %v278_v60, %v294_v58  ;;  %v298_v21 = vmax.f32 %v281_v17, %v291_v10 }
 0x170   :  { %v306_v1 = vpop.permute.xlu0 %305  ;;  %v299_v8 = vsel %vm1818_vm4, %v295_v63, %v278_v60  ;;  %v302_v33 = vsel %vm1814_vm13, %v298_v21, %v281_v17 }
 0x171   :  { %v264_v2 = vpop.permute.xlu1 %263  ;;  %v314_v9 = vsel %vm1822_vm5, %v304_v56, %v306_v1 }
 0x172   :  { %v271_v4 = vsel %vm269_vm1, %v264_v2, %v266_v44  ;;  %v272_v5 = vsel %vm269_vm1, %v262_v42, %v264_v2  ;;  %v316_v18 = vmax.f32 %v299_v8, %v314_v9 }
 0x173   :  { %v275_v6 = vmax.f32 %v1151_v40, %v272_v5  ;;  %v276_v7 = vmax.f32 %v1139_v36, %v271_v4 }
 0x174   :  { %v310_v11 = vpop.permute.xlu0 %309  ;;  %v320_v31 = vsel %vm1802_vm11, %v316_v18, %v299_v8  ;;  %vm1806_vm11 = vcmp.lt.s32.totalorder %v1209_v61, 14  ;;  %v225_v8 = vand.u32 255, %v1177_v43 }
 0x175   :  { %v308_v14 = vpop.permute.xlu1 %307  ;;  %v279_v15 = vsel %vm1820_vm7, %v275_v6, %v1151_v40  ;;  %v280_v16 = vsel %vm1819_vm8, %v276_v7, %v1139_v36  ;;  %v315_v28 = vsel %vm1822_vm5, %v310_v11, %v304_v56 }
 0x176   :  { %v296_v19 = vmax.f32 %v279_v15, %v293_v13  ;;  %v297_v20 = vmax.f32 %v280_v16, %v292_v12  ;;  %v313_v23 = vsel %vm1822_vm5, %v306_v1, %v308_v14  ;;  %v312_v27 = vsel %vm1822_vm5, %v308_v14, %v310_v11 }
 0x177   :  { %v319_v37 = vmax.f32 %v302_v33, %v315_v28 }
 0x178   :  { %v300_v22 = vsel %vm1803_vm9, %v296_v19, %v279_v15  ;;  %v301_v24 = vsel %vm1801_vm10, %v297_v20, %v280_v16  ;;  %v327_v25 = vpop.permute.xlu0 %326  ;;  %vm1808_vm10 = vcmp.lt.s32.totalorder %v1198_v57, 15  ;;  %vm1807_vm9 = vcmp.lt.s32.totalorder %v1203_v59, 14 }
 0x179   :  { %v317_v26 = vmax.f32 %v300_v22, %v313_v23  ;;  %v325_v29 = vpop.permute.xlu1 %324  ;;  %v318_v30 = vmax.f32 %v301_v24, %v312_v27  ;;  %v323_v55 = vsel %vm1808_vm10, %v319_v37, %v302_v33  ;;  %vm1816_vm10 = vcmp.lt.s32.totalorder %v1177_v43, 112 }
 0x17a   :  { %v335_v32 = vsel %vm1813_vm12, %v325_v29, %v327_v25  ;;  %v227_v16 = vand.u32 255, %v1193_v54 }
 0x17b   :  { %v337_v35 = vmax.f32 %v320_v31, %v335_v32  ;;  %v321_v44 = vsel %vm1809_vm15, %v317_v26, %v300_v22  ;;  %v322_v46 = vsel %vm1804_vm0, %v318_v30, %v301_v24  ;;  %vm1805_vm0 = vcmp.lt.s32.totalorder %v1198_v57, 14 }
 0x17c   :  { %v331_v38 = vpop.permute.xlu0 %330  ;;  %v226_v24 = vand.u32 255, %v1189_v52  ;;  %vm1347_vm15 = vcmp.ge.s32.totalorder %v225_v8, 16 }
 0x17d   :  { %v341_v41 = vsel %vm1810_vm14, %v337_v35, %v320_v31  ;;  %v329_v42 = vpop.permute.xlu1 %328  ;;  %v336_v49 = vsel %vm1813_vm12, %v331_v38, %v325_v29  ;;  %vm1351_vm14 = vcmp.ge.s32.totalorder %v227_v16, 32 }
 0x17e   :  { %v334_v45 = vsel %vm1813_vm12, %v327_v25, %v329_v42  ;;  %v333_v47 = vsel %vm1813_vm12, %v329_v42, %v331_v38  ;;  %345 = vrot.lane.b32.xlu1 %v341_v41, %s1080_s22  ;;  %v340_v56 = vmax.f32 %v323_v55, %v336_v49  ;;  %vm1375_vm12 = vcmp.ge.s32.totalorder %v227_v16, 16 }
 0x17f   :  { %v338_v50 = vmax.f32 %v321_v44, %v334_v45  ;;  %v339_v53 = vmax.f32 %v322_v46, %v333_v47  ;;  %vm1379_vm13 = vcmp.lt.s32.totalorder %v226_v24, 224 }
 0x180   :  { %v1298_v62 = vsel %vm1805_vm0, %v340_v56, %v323_v55  ;;  %vm1811_vm0 = vcmp.lt.s32.totalorder %v1177_v43, 32 }
 0x181   :  { %v1288_v58 = vsel %vm1806_vm11, %v339_v53, %v322_v46  ;;  %v342_v60 = vsel %vm1807_vm9, %v338_v50, %v321_v44  ;;  %vm1812_vm11 = vcmp.lt.s32.totalorder %v1177_v43, 16  ;;  %vm1327_vm9 = vcmp.ge.s32.totalorder %v225_v8, 32  ;;  %v750_v53 = vld [vmem:[%s1798_s3 + $0x8] sm:$0xff] }
 0x182   :  { %347 = vrot.lane.b32.xlu0 %v342_v60, %s1080_s22  ;;  %349 = vrot.lane.b32.xlu1 %v1288_v58, %s1080_s22  ;;  %v228_v44 = vand.u32 255, %v1186_v51 }
 0x184   :  { %vm1393_vm6 = vcmp.lt.s32.totalorder %v228_v44, 240 }
 0x186   :  { %351 = vrot.lane.b32.xlu0 %v1298_v62, %s1080_s22  ;;  %366 = vrot.lane.b32.xlu1 %v341_v41, %s1087_s30 }
 0x18a   :  { %368 = vrot.lane.b32.xlu0 %v342_v60, %s1087_s30  ;;  %370 = vrot.lane.b32.xlu1 %v1288_v58, %s1087_s30 }
 0x18e   :  { %372 = vrot.lane.b32.xlu0 %v1298_v62, %s1087_s30  ;;  %387 = vrot.lane.b32.xlu1 %v341_v41, %s1088_s6 }
 0x192   :  { %389 = vrot.lane.b32.xlu0 %v342_v60, %s1088_s6  ;;  %391 = vrot.lane.b32.xlu1 %v1288_v58, %s1088_s6 }
 0x196   :  { %393 = vrot.lane.b32.xlu0 %v1298_v62, %s1088_s6  ;;  %408 = vrot.lane.b32.xlu1 %v341_v41, %s1089_s7 }
 0x19a   :  { %410 = vrot.lane.b32.xlu0 %v342_v60, %s1089_s7  ;;  %412 = vrot.lane.b32.xlu1 %v1288_v58, %s1089_s7 }
 0x19e   :  { %414 = vrot.lane.b32.xlu0 %v1298_v62, %s1089_s7 }
 0x1f0   :  { %v346_v63 = vpop.permute.xlu1 %345 }
 0x1f4   :  { %v350_v1 = vpop.permute.xlu1 %349  ;;  %v348_v2 = vpop.permute.xlu0 %347 }
 0x1f5   :  { %v356_v12 = vsel %vm1811_vm0, %v346_v63, %v348_v2  ;;  %v355_v15 = vsel %vm1811_vm0, %v348_v2, %v350_v1 }
 0x1f6   :  { %v359_v18 = vmax.f32 %v342_v60, %v356_v12  ;;  %v360_v25 = vmax.f32 %v1288_v58, %v355_v15 }
 0x1f8   :  { %v367_v3 = vpop.permute.xlu1 %366  ;;  %v352_v4 = vpop.permute.xlu0 %351 }
 0x1f9   :  { %v357_v7 = vsel %vm1811_vm0, %v352_v4, %v346_v63  ;;  %v354_v54 = vsel %vm1811_vm0, %v350_v1, %v352_v4  ;;  %vm1364_vm0 = vcmp.lt.s32.totalorder %v226_v24, 240 }
 0x1fa   :  { %v358_v9 = vmax.f32 %v341_v41, %v357_v7  ;;  %v361_v33 = vmax.f32 %v1298_v62, %v354_v54 }
 0x1fc   :  { %v371_v5 = vpop.permute.xlu1 %370  ;;  %v369_v6 = vpop.permute.xlu0 %368  ;;  %v362_v19 = vsel %vm1327_vm9, %v358_v9, %v341_v41  ;;  %v364_v41 = vsel %vm1351_vm14, %v360_v25, %v1288_v58 }
 0x1fd   :  { %v377_v17 = vsel %vm1812_vm11, %v367_v3, %v369_v6  ;;  %v376_v29 = vsel %vm1812_vm11, %v369_v6, %v371_v5 }
 0x1fe   :  { %v380_v26 = vmax.f32 %v359_v18, %v377_v17  ;;  %v381_v45 = vmax.f32 %v364_v41, %v376_v29 }
 0x200   :  { %v388_v10 = vpop.permute.xlu1 %387  ;;  %v373_v11 = vpop.permute.xlu0 %372 }
 0x201   :  { %v378_v14 = vsel %vm1812_vm11, %v373_v11, %v367_v3  ;;  %v375_v52 = vsel %vm1812_vm11, %v371_v5, %v373_v11  ;;  %vm416_vm11 = vcmp.lt.s32.totalorder %v1177_v43, 96  ;;  %v385_v3 = vsel %vm1375_vm12, %v381_v45, %v364_v41 }
 0x202   :  { %v379_v22 = vmax.f32 %v362_v19, %v378_v14  ;;  %v382_v46 = vmax.f32 %v361_v33, %v375_v52 }
 0x204   :  { %v392_v20 = vpop.permute.xlu1 %391  ;;  %v390_v21 = vpop.permute.xlu0 %389  ;;  %v383_v35 = vsel %vm1347_vm15, %v379_v22, %v362_v19 }
 0x205   :  { %v397_v23 = vsel %vm1816_vm10, %v390_v21, %v392_v20  ;;  %v398_v37 = vsel %vm1816_vm10, %v388_v10, %v390_v21 }
 0x206   :  { %v401_v30 = vmax.f32 %v380_v26, %v397_v23  ;;  %v400_v47 = vmax.f32 %v383_v35, %v398_v37 }
 0x208   :  { %v409_v31 = vpop.permute.xlu1 %408  ;;  %v394_v32 = vpop.permute.xlu0 %393  ;;  %v405_v55 = vsel %vm1364_vm0, %v401_v30, %v380_v26 }
 0x209   :  { %v399_v42 = vsel %vm1816_vm10, %v394_v32, %v388_v10  ;;  %v396_v58 = vsel %vm1816_vm10, %v392_v20, %v394_v32  ;;  %vm1405_vm10 = vcmp.lt.s32.totalorder %v228_v44, 224 }
 0x20a   :  { %v403_v51 = vmax.f32 %v382_v46, %v399_v42  ;;  %v402_v4 = vmax.f32 %v385_v3, %v396_v58 }
 0x20c   :  { %v413_v50 = vpop.permute.xlu1 %412  ;;  %v411_v56 = vpop.permute.xlu0 %410  ;;  %v407_v8 = vsel %vm1393_vm6, %v403_v51, %v382_v46 }
 0x20d   :  { %v418_v60 = vsel %vm416_vm11, %v411_v56, %v413_v50  ;;  %v419_v62 = vsel %vm416_vm11, %v409_v31, %v411_v56 }
 0x20e   :  { %v1391_v63 = vmax.f32 %v400_v47, %v419_v62  ;;  %v422_v1 = vmax.f32 %v405_v55, %v418_v60 }
 0x210   :  { %v1401_v5 = vsel %vm1379_vm13, %v422_v1, %v405_v55  ;;  %429 = vrot.lane.b32.xlu1 %v1391_v63, %s1083_s1  ;;  %v415_v6 = vpop.permute.xlu0 %414 }
 0x211   :  { %v417_v9 = vsel %vm416_vm11, %v413_v50, %v415_v6  ;;  %v420_v10 = vsel %vm416_vm11, %v415_v6, %v409_v31  ;;  %431 = vrot.lane.b32.xlu0 %v1401_v5, %s1083_s1 }
 0x212   :  { %v1417_v11 = vmax.f32 %v402_v4, %v417_v9  ;;  %v424_v12 = vmax.f32 %v407_v8, %v420_v10 }
 0x214   :  { %v1421_v14 = vsel %vm1405_vm10, %v424_v12, %v407_v8  ;;  %433 = vrot.lane.b32.xlu1 %v1417_v11, %s1083_s1 }
 0x215   :  { %435 = vrot.lane.b32.xlu0 %v1421_v14, %s1083_s1 }
 0x218   :  { %449 = vrot.lane.b32.xlu1 %v1391_v63, %s1084_s2 }
 0x219   :  { %451 = vrot.lane.b32.xlu0 %v1401_v5, %s1084_s2 }
 0x21c   :  { %453 = vrot.lane.b32.xlu1 %v1417_v11, %s1084_s2 }
 0x21d   :  { %455 = vrot.lane.b32.xlu0 %v1421_v14, %s1084_s2 }
 0x220   :  { %469 = vrot.lane.b32.xlu1 %v1391_v63, %s1085_s28 }
 0x221   :  { %471 = vrot.lane.b32.xlu0 %v1401_v5, %s1085_s28 }
 0x224   :  { %473 = vrot.lane.b32.xlu1 %v1417_v11, %s1085_s28 }
 0x225   :  { %475 = vrot.lane.b32.xlu0 %v1421_v14, %s1085_s28 }
 0x228   :  { %489 = vrot.lane.b32.xlu1 %v1391_v63, %s1086_s29 }
 0x229   :  { %491 = vrot.lane.b32.xlu0 %v1401_v5, %s1086_s29 }
 0x22c   :  { %493 = vrot.lane.b32.xlu1 %v1417_v11, %s1086_s29 }
 0x22d   :  { %495 = vrot.lane.b32.xlu0 %v1421_v14, %s1086_s29 }
 0x282   :  { %v430_v15 = vpop.permute.xlu1 %429 }
 0x283   :  { %v432_v16 = vpop.permute.xlu0 %431 }
 0x284   :  { %v439_v23 = vsel %vm269_vm1, %v430_v15, %v432_v16 }
 0x285   :  { %v442_v30 = vmax.f32 %v1401_v5, %v439_v23 }
 0x286   :  { %v434_v17 = vpop.permute.xlu1 %433 }
 0x287   :  { %v436_v18 = vpop.permute.xlu0 %435  ;;  %v438_v25 = vsel %vm269_vm1, %v432_v16, %v434_v17  ;;  %v446_v44 = vsel %vm1820_vm7, %v442_v30, %v1401_v5  ;;  %vm1843_vm7 = vcmp.lt.s32.totalorder %v1183_v48, 15 }
 0x288   :  { %v440_v19 = vsel %vm269_vm1, %v436_v18, %v430_v15  ;;  %v437_v26 = vsel %vm269_vm1, %v434_v17, %v436_v18  ;;  %v443_v32 = vmax.f32 %v1417_v11, %v438_v25 }
 0x289   :  { %v441_v22 = vmax.f32 %v1391_v63, %v440_v19  ;;  %v444_v35 = vmax.f32 %v1421_v14, %v437_v26 }
 0x28a   :  { %v450_v20 = vpop.permute.xlu1 %449  ;;  %v447_v55 = vsel %vm1819_vm8, %v443_v32, %v1417_v11  ;;  %vm1841_vm8 = vcmp.ge.s32.totalorder %v1209_v61, 1 }
 0x28b   :  { %v452_v21 = vpop.permute.xlu0 %451  ;;  %v445_v29 = vsel %vm1817_vm2, %v441_v22, %v1391_v63  ;;  %vm1839_vm2 = vcmp.ge.s32.totalorder %v1198_v57, 2 }
 0x28c   :  { %v459_v37 = vsel %vm1821_vm3, %v450_v20, %v452_v21  ;;  %v448_v51 = vsel %vm1839_vm2, %v444_v35, %v1421_v14  ;;  %vm1842_vm2 = vcmp.ge.s32.totalorder %v1198_v57, 1 }
 0x28d   :  { %v462_v50 = vmax.f32 %v446_v44, %v459_v37 }
 0x28e   :  { %v454_v24 = vpop.permute.xlu1 %453 }
 0x28f   :  { %v456_v54 = vpop.permute.xlu0 %455  ;;  %v458_v42 = vsel %vm1821_vm3, %v452_v21, %v454_v24 }
 0x290   :  { %v460_v52 = vsel %vm1821_vm3, %v456_v54, %v450_v20  ;;  %v457_v45 = vsel %vm1821_vm3, %v454_v24, %v456_v54  ;;  %v463_v58 = vmax.f32 %v447_v55, %v458_v42  ;;  %vm1844_vm3 = vcmp.lt.s32.totalorder %v1177_v43, 126 }
 0x291   :  { %v461_v31 = vmax.f32 %v445_v29, %v460_v52  ;;  %v464_v62 = vmax.f32 %v448_v51, %v457_v45 }
 0x292   :  { %v470_v33 = vpop.permute.xlu1 %469  ;;  %v467_v12 = vsel %vm1841_vm8, %v463_v58, %v447_v55  ;;  %vm1847_vm8 = vmmov %vm1844_vm3 }
 0x293   :  { %v472_v41 = vpop.permute.xlu0 %471  ;;  %v465_v46 = vsel %vm1818_vm4, %v461_v31, %v445_v29  ;;  %vm1840_vm4 = vcmp.ge.s32.totalorder %v1203_v59, 1  ;;  %v468_v16 = vsel %vm1842_vm2, %v464_v62, %v448_v51  ;;  %vm1848_vm2 = vcmp.lt.s32.totalorder %v1209_v61, 15 }
 0x294   :  { %v479_v47 = vsel %vm1822_vm5, %v470_v33, %v472_v41  ;;  %v466_v6 = vsel %vm1840_vm4, %v462_v50, %v446_v44  ;;  %vm1845_vm4 = vcmp.lt.s32.totalorder %v1183_v48, 14 }
 0x295   :  { %v481_v1 = vmax.f32 %v465_v46, %v479_v47 }
 0x296   :  { %v474_v56 = vpop.permute.xlu1 %473 }
 0x297   :  { %v476_v60 = vpop.permute.xlu0 %475  ;;  %v478_v3 = vsel %vm1822_vm5, %v472_v41, %v474_v56  ;;  %v485_v18 = vsel %vm1843_vm7, %v481_v1, %v465_v46  ;;  %vm1849_vm7 = vmmov %vm1844_vm3 }
 0x298   :  { %v477_v4 = vsel %vm1822_vm5, %v474_v56, %v476_v60  ;;  %v480_v8 = vsel %vm1822_vm5, %v476_v60, %v470_v33  ;;  %v482_v10 = vmax.f32 %v466_v6, %v478_v3  ;;  %vm1846_vm5 = vcmp.lt.s32.totalorder %v1203_v59, 15 }
 0x299   :  { %v483_v17 = vmax.f32 %v467_v12, %v477_v4  ;;  %v484_v20 = vmax.f32 %v468_v16, %v480_v8 }
 0x29a   :  { %v490_v9 = vpop.permute.xlu1 %489  ;;  %v486_v24 = vsel %vm1846_vm5, %v482_v10, %v466_v6  ;;  %vm1851_vm5 = vcmp.lt.s32.totalorder %v1203_v59, 14 }
 0x29b   :  { %v492_v15 = vpop.permute.xlu0 %491  ;;  %v487_v29 = vsel %vm1848_vm2, %v483_v17, %v467_v12  ;;  %vm1853_vm2 = vcmp.lt.s32.totalorder %v1198_v57, 14 }
 0x29c   :  { %v499_v19 = vsel %vm1844_vm3, %v490_v9, %v492_v15 }
 0x29d   :  { %v501_v21 = vmax.f32 %v485_v18, %v499_v19 }
 0x29e   :  { %v494_v22 = vpop.permute.xlu1 %493 }
 0x29f   :  { %v505_v23 = vsel %vm1845_vm4, %v501_v21, %v485_v18  ;;  %v498_v25 = vsel %vm1847_vm8, %v492_v15, %v494_v22  ;;  %v496_v54 = vpop.permute.xlu0 %495  ;;  %vm1850_vm4 = vcmp.lt.s32.totalorder %v1198_v57, 15  ;;  %vm1852_vm8 = vcmp.lt.s32.totalorder %v1209_v61, 14 }
 0x2a0   :  { %v502_v26 = vmax.f32 %v486_v24, %v498_v25  ;;  %v497_v52 = vsel %vm1849_vm7, %v494_v22, %v496_v54  ;;  %v500_v30 = vsel %vm1844_vm3, %v496_v54, %v490_v9  ;;  %509 = vrot.lane.b32.xlu1 %v505_v23, %s1080_s22  ;;  %v488_v31 = vsel %vm1850_vm4, %v484_v20, %v468_v16 }
 0x2a1   :  { %v503_v32 = vmax.f32 %v487_v29, %v497_v52  ;;  %v504_v33 = vmax.f32 %v488_v31, %v500_v30  ;;  %vm1854_vm7 = vcmp.lt.s32.totalorder %v1177_v43, 32  ;;  %vm1855_vm3 = vcmp.lt.s32.totalorder %v1177_v43, 16 }
 0x2a2   :  { %v506_v35 = vsel %vm1851_vm5, %v502_v26, %v486_v24  ;;  %vm1856_vm4 = vmmov %vm1854_vm7 }
 0x2a3   :  { %v507_v37 = vsel %vm1852_vm8, %v503_v32, %v487_v29  ;;  %511 = vrot.lane.b32.xlu0 %v506_v35, %s1080_s22  ;;  %v508_v41 = vsel %vm1853_vm2, %v504_v33, %v488_v31  ;;  %vm1857_vm5 = vmmov %vm1856_vm4 }
 0x2a4   :  { %513 = vrot.lane.b32.xlu1 %v507_v37, %s1080_s22  ;;  %vm1858_vm8 = vmmov %vm1855_vm3 }
 0x2a5   :  { %vm1859_vm2 = vmmov %vm1856_vm4 }
 0x2a7   :  { %515 = vrot.lane.b32.xlu0 %v508_v41, %s1080_s22 }
 0x2a8   :  { %529 = vrot.lane.b32.xlu1 %v505_v23, %s1087_s30 }
 0x2ab   :  { %531 = vrot.lane.b32.xlu0 %v506_v35, %s1087_s30 }
 0x2ac   :  { %533 = vrot.lane.b32.xlu1 %v507_v37, %s1087_s30 }
 0x2af   :  { %535 = vrot.lane.b32.xlu0 %v508_v41, %s1087_s30 }
 0x2b0   :  { %549 = vrot.lane.b32.xlu1 %v505_v23, %s1088_s6 }
 0x2b3   :  { %551 = vrot.lane.b32.xlu0 %v506_v35, %s1088_s6 }
 0x2b4   :  { %553 = vrot.lane.b32.xlu1 %v507_v37, %s1088_s6 }
 0x2b7   :  { %555 = vrot.lane.b32.xlu0 %v508_v41, %s1088_s6 }
 0x2b8   :  { %569 = vrot.lane.b32.xlu1 %v505_v23, %s1089_s7 }
 0x2bb   :  { %571 = vrot.lane.b32.xlu0 %v506_v35, %s1089_s7 }
 0x2bc   :  { %573 = vrot.lane.b32.xlu1 %v507_v37, %s1089_s7 }
 0x2bf   :  { %575 = vrot.lane.b32.xlu0 %v508_v41, %s1089_s7 }
 0x312   :  { %v510_v42 = vpop.permute.xlu1 %509 }
 0x315   :  { %v512_v44 = vpop.permute.xlu0 %511 }
 0x316   :  { %v514_v45 = vpop.permute.xlu1 %513  ;;  %v519_v1 = vsel %vm1856_vm4, %v510_v42, %v512_v44  ;;  %vm1861_vm4 = vmmov %vm1855_vm3 }
 0x317   :  { %v518_v3 = vsel %vm1857_vm5, %v512_v44, %v514_v45  ;;  %v522_v12 = vmax.f32 %v506_v35, %v519_v1 }
 0x318   :  { %v523_v15 = vmax.f32 %v507_v37, %v518_v3 }
 0x319   :  { %v516_v46 = vpop.permute.xlu0 %515 }
 0x31a   :  { %v530_v47 = vpop.permute.xlu1 %529  ;;  %v520_v55 = vsel %vm1854_vm7, %v516_v46, %v510_v42  ;;  %v517_v16 = vsel %vm1859_vm2, %v514_v45, %v516_v46  ;;  %vm1860_vm7 = vcmp.lt.s32.totalorder %v1177_v43, 112  ;;  %v527_v54 = vsel %vm1351_vm14, %v523_v15, %v507_v37 }
 0x31b   :  { %v521_v58 = vmax.f32 %v505_v23, %v520_v55  ;;  %v524_v22 = vmax.f32 %v508_v41, %v517_v16  ;;  %vm1862_vm5 = vmmov %vm1860_vm7 }
 0x31c   :  { %vm1864_vm2 = vmmov %vm1862_vm5 }
 0x31d   :  { %v532_v50 = vpop.permute.xlu0 %531  ;;  %v525_v4 = vsel %vm1327_vm9, %v521_v58, %v505_v23 }
 0x31e   :  { %v534_v56 = vpop.permute.xlu1 %533  ;;  %v539_v8 = vsel %vm1858_vm8, %v530_v47, %v532_v50  ;;  %vm1863_vm8 = vmmov %vm1862_vm5 }
 0x31f   :  { %v542_v18 = vmax.f32 %v522_v12, %v539_v8  ;;  %v538_v19 = vsel %vm1855_vm3, %v532_v50, %v534_v56 }
 0x320   :  { %v543_v52 = vmax.f32 %v527_v54, %v538_v19 }
 0x321   :  { %v536_v51 = vpop.permute.xlu0 %535 }
 0x322   :  { %v550_v60 = vpop.permute.xlu1 %549  ;;  %v540_v62 = vsel %vm1855_vm3, %v536_v51, %v530_v47  ;;  %v537_v20 = vsel %vm1861_vm4, %v534_v56, %v536_v51  ;;  %v547_v46 = vsel %vm1375_vm12, %v543_v52, %v527_v54  ;;  %vm1866_vm3 = vcmp.lt.s32.totalorder %v1177_v43, 1 }
 0x323   :  { %v541_v9 = vmax.f32 %v525_v4, %v540_v62  ;;  %v544_v30 = vmax.f32 %v524_v22, %v537_v20  ;;  %vm1867_vm4 = vmmov %vm1866_vm3 }
 0x325   :  { %v552_v6 = vpop.permute.xlu0 %551  ;;  %v545_v23 = vsel %vm1347_vm15, %v541_v9, %v525_v4 }
 0x326   :  { %v554_v10 = vpop.permute.xlu1 %553  ;;  %v559_v24 = vsel %vm1862_vm5, %v550_v60, %v552_v6  ;;  %vm1869_vm5 = vmmov %vm1866_vm3 }
 0x327   :  { %v558_v17 = vsel %vm1860_vm7, %v552_v6, %v554_v10  ;;  %v561_v31 = vmax.f32 %v545_v23, %v559_v24  ;;  %vm1865_vm7 = vcmp.ge.s32.totalorder %v1183_v48, 2 }
 0x328   :  { %v562_v26 = vmax.f32 %v542_v18, %v558_v17 }
 0x329   :  { %v556_v21 = vpop.permute.xlu0 %555 }
 0x32a   :  { %v570_v25 = vpop.permute.xlu1 %569  ;;  %v560_v29 = vsel %vm1863_vm8, %v556_v21, %v550_v60  ;;  %v557_v33 = vsel %vm1864_vm2, %v554_v10, %v556_v21  ;;  %v566_v37 = vsel %vm1364_vm0, %v562_v26, %v542_v18  ;;  %vm1870_vm8 = vmmov %vm1866_vm3  ;;  %vm1871_vm2 = vcmp.ge.s32.totalorder %v1183_v48, 1 }
 0x32b   :  { %v564_v35 = vmax.f32 %v544_v30, %v560_v29  ;;  %v563_v50 = vmax.f32 %v547_v46, %v557_v33 }
 0x32d   :  { %v572_v32 = vpop.permute.xlu0 %571  ;;  %v568_v58 = vsel %vm1393_vm6, %v564_v35, %v544_v30 }
 0x32e   :  { %v579_v41 = vsel %vm416_vm11, %v570_v25, %v572_v32  ;;  %v574_v42 = vpop.permute.xlu1 %573 }
 0x32f   :  { %v1571_v44 = vmax.f32 %v561_v31, %v579_v41  ;;  %v578_v45 = vsel %vm416_vm11, %v572_v32, %v574_v42 }
 0x330   :  { %v582_v47 = vmax.f32 %v566_v37, %v578_v45 }
 0x331   :  { %589 = vrot.lane.b32.xlu1 %v1571_v44, %s1083_s1  ;;  %v576_v55 = vpop.permute.xlu0 %575 }
 0x332   :  { %v1583_v56 = vsel %vm1379_vm13, %v582_v47, %v566_v37  ;;  %v577_v51 = vsel %vm416_vm11, %v574_v42, %v576_v55  ;;  %v580_v60 = vsel %vm416_vm11, %v576_v55, %v570_v25 }
 0x333   :  { %v1591_v62 = vmax.f32 %v563_v50, %v577_v51  ;;  %v584_v1 = vmax.f32 %v568_v58, %v580_v60  ;;  %591 = vrot.lane.b32.xlu0 %v1583_v56, %s1083_s1 }
 0x335   :  { %v1597_v3 = vsel %vm1405_vm10, %v584_v1, %v568_v58  ;;  %593 = vrot.lane.b32.xlu1 %v1591_v62, %s1083_s1 }
 0x337   :  { %595 = vrot.lane.b32.xlu0 %v1597_v3, %s1083_s1 }
 0x339   :  { %609 = vrot.lane.b32.xlu1 %v1571_v44, %s1084_s2 }
 0x33b   :  { %611 = vrot.lane.b32.xlu0 %v1583_v56, %s1084_s2 }
 0x33d   :  { %613 = vrot.lane.b32.xlu1 %v1591_v62, %s1084_s2 }
 0x33f   :  { %615 = vrot.lane.b32.xlu0 %v1597_v3, %s1084_s2 }
 0x341   :  { %629 = vrot.lane.b32.xlu1 %v1571_v44, %s1085_s28 }
 0x343   :  { %631 = vrot.lane.b32.xlu0 %v1583_v56, %s1085_s28 }
 0x345   :  { %633 = vrot.lane.b32.xlu1 %v1591_v62, %s1085_s28 }
 0x347   :  { %635 = vrot.lane.b32.xlu0 %v1597_v3, %s1085_s28 }
 0x349   :  { %649 = vrot.lane.b32.xlu1 %v1571_v44, %s1086_s29 }
 0x34b   :  { %651 = vrot.lane.b32.xlu0 %v1583_v56, %s1086_s29 }
 0x34d   :  { %653 = vrot.lane.b32.xlu1 %v1591_v62, %s1086_s29 }
 0x34f   :  { %655 = vrot.lane.b32.xlu0 %v1597_v3, %s1086_s29 }
 0x3a3   :  { %v590_v4 = vpop.permute.xlu1 %589 }
 0x3a5   :  { %v592_v6 = vpop.permute.xlu0 %591 }
 0x3a6   :  { %v599_v17 = vsel %vm269_vm1, %v590_v4, %v592_v6 }
 0x3a7   :  { %v594_v8 = vpop.permute.xlu1 %593  ;;  %v602_v22 = vmax.f32 %v1583_v56, %v599_v17 }
 0x3a8   :  { %v598_v19 = vsel %vm269_vm1, %v592_v6, %v594_v8 }
 0x3a9   :  { %v596_v9 = vpop.permute.xlu0 %595  ;;  %v603_v26 = vmax.f32 %v1591_v62, %v598_v19 }
 0x3aa   :  { %v600_v10 = vsel %vm269_vm1, %v596_v9, %v590_v4  ;;  %v597_v20 = vsel %vm269_vm1, %v594_v8, %v596_v9  ;;  %vm1868_vm1 = vcmp.ge.s32.totalorder %v1203_v59, 2 }
 0x3ab   :  { %v610_v12 = vpop.permute.xlu1 %609  ;;  %v601_v16 = vmax.f32 %v1571_v44, %v600_v10  ;;  %v604_v29 = vmax.f32 %v1597_v3, %v597_v20  ;;  %v606_v31 = vsel %vm1868_vm1, %v602_v22, %v1583_v56 }
 0x3ad   :  { %v612_v15 = vpop.permute.xlu0 %611  ;;  %v605_v23 = vsel %vm1865_vm7, %v601_v16, %v1571_v44  ;;  %vm1872_vm7 = vcmp.lt.s32.totalorder %v1177_v43, 127 }
 0x3ae   :  { %v619_v52 = vsel %vm1867_vm4, %v610_v12, %v612_v15  ;;  %vm1874_vm4 = vcmp.ge.s32.totalorder %v1198_v57, 2  ;;  %vm1875_vm1 = vmmov %vm1872_vm7 }
 0x3af   :  { %v614_v18 = vpop.permute.xlu1 %613  ;;  %v622_v35 = vmax.f32 %v606_v31, %v619_v52  ;;  %v608_v46 = vsel %vm1874_vm4, %v604_v29, %v1597_v3  ;;  %vm1881_vm4 = vcmp.lt.s32.totalorder %v1183_v48, 15 }
 0x3b0   :  { %v618_v32 = vsel %vm1869_vm5, %v612_v15, %v614_v18  ;;  %vm1876_vm5 = vcmp.ge.s32.totalorder %v1203_v59, 1 }
 0x3b1   :  { %v616_v21 = vpop.permute.xlu0 %615  ;;  %v626_v60 = vsel %vm1876_vm5, %v622_v35, %v606_v31  ;;  %vm1883_vm5 = vcmp.lt.s32.totalorder %v1203_v59, 15 }
 0x3b2   :  { %v620_v24 = vsel %vm1866_vm3, %v616_v21, %v610_v12  ;;  %v617_v33 = vsel %vm1870_vm8, %v614_v18, %v616_v21  ;;  %vm1873_vm3 = vcmp.ge.s32.totalorder %v1209_v61, 2  ;;  %vm1877_vm8 = vmmov %vm1875_vm1 }
 0x3b3   :  { %v621_v25 = vmax.f32 %v605_v23, %v620_v24  ;;  %v630_v54 = vpop.permute.xlu1 %629  ;;  %v607_v45 = vsel %vm1873_vm3, %v603_v26, %v1591_v62  ;;  %v624_v50 = vmax.f32 %v608_v46, %v617_v33  ;;  %vm1880_vm3 = vcmp.ge.s32.totalorder %v1198_v57, 1 }
 0x3b4   :  { %v623_v47 = vmax.f32 %v607_v45, %v618_v32 }
 0x3b5   :  { %v632_v30 = vpop.permute.xlu0 %631  ;;  %v625_v41 = vsel %vm1871_vm2, %v621_v25, %v605_v23  ;;  %vm1878_vm2 = vmmov %vm1875_vm1  ;;  %v628_v10 = vsel %vm1880_vm3, %v624_v50, %v608_v46  ;;  %vm1887_vm3 = vcmp.lt.s32.totalorder %v1198_v57, 15 }
 0x3b6   :  { %v639_v42 = vsel %vm1872_vm7, %v630_v54, %v632_v30  ;;  %vm1879_vm7 = vcmp.ge.s32.totalorder %v1209_v61, 1 }
 0x3b7   :  { %v634_v37 = vpop.permute.xlu1 %633  ;;  %v641_v51 = vmax.f32 %v625_v41, %v639_v42  ;;  %v627_v9 = vsel %vm1879_vm7, %v623_v47, %v607_v45  ;;  %vm1886_vm7 = vcmp.lt.s32.totalorder %v1209_v61, 15 }
 0x3b8   :  { %v638_v55 = vsel %vm1875_vm1, %v632_v30, %v634_v37  ;;  %vm1882_vm1 = vcmp.lt.s32.totalorder %v1177_v43, 126 }
 0x3b9   :  { %v636_v58 = vpop.permute.xlu0 %635  ;;  %v642_v8 = vmax.f32 %v626_v60, %v638_v55  ;;  %v645_v17 = vsel %vm1881_vm4, %v641_v51, %v625_v41  ;;  %vm1888_vm4 = vmmov %vm1882_vm1 }
 0x3ba   :  { %v637_v1 = vsel %vm1877_vm8, %v634_v37, %v636_v58  ;;  %v640_v4 = vsel %vm1878_vm2, %v636_v58, %v630_v54  ;;  %vm1884_vm8 = vmmov %vm1882_vm1  ;;  %vm1885_vm2 = vcmp.lt.s32.totalorder %v1183_v48, 14 }
 0x3bb   :  { %v650_v6 = vpop.permute.xlu1 %649  ;;  %v643_v15 = vmax.f32 %v627_v9, %v637_v1  ;;  %v644_v16 = vmax.f32 %v628_v10, %v640_v4  ;;  %v646_v21 = vsel %vm1883_vm5, %v642_v8, %v626_v60  ;;  %vm1889_vm5 = vcmp.lt.s32.totalorder %v1203_v59, 14  ;;  %v751_v59 = vld [vmem:[%s1799_s4] sm:$0xff] }
 0x3bd   :  { %v652_v12 = vpop.permute.xlu0 %651  ;;  %v647_v54 = vsel %vm1886_vm7, %v643_v15, %v627_v9  ;;  %v648_v26 = vsel %vm1887_vm3, %v644_v16, %v628_v10  ;;  %vm1892_vm7 = vcmp.lt.s32.totalorder %v1177_v43, 32 }
 0x3be   :  { %v659_v18 = vsel %vm1882_vm1, %v650_v6, %v652_v12  ;;  %vm1893_vm3 = vmmov %vm1892_vm7 }
 0x3bf   :  { %v661_v19 = vmax.f32 %v645_v17, %v659_v18  ;;  %v654_v20 = vpop.permute.xlu1 %653 }
 0x3c0   :  { %v658_v22 = vsel %vm1884_vm8, %v652_v12, %v654_v20  ;;  %vm1890_vm8 = vcmp.lt.s32.totalorder %v1209_v61, 14 }
 0x3c1   :  { %v665_v23 = vsel %vm1885_vm2, %v661_v19, %v645_v17  ;;  %v662_v24 = vmax.f32 %v646_v21, %v658_v22  ;;  %v656_v25 = vpop.permute.xlu0 %655  ;;  %vm1891_vm2 = vcmp.lt.s32.totalorder %v1198_v57, 14  ;;  %v752_v57 = vld [vmem:[%s1799_s4 + $0x8] sm:$0xff] }
 0x3c2   :  { %v657_v29 = vsel %vm1888_vm4, %v654_v20, %v656_v25  ;;  %v660_v52 = vsel %vm1882_vm1, %v656_v25, %v650_v6  ;;  %669 = vrot.lane.b32.xlu1 %v665_v23, %s1080_s22  ;;  %vm1894_vm4 = vmmov %vm1893_vm3 }
 0x3c3   :  { %v663_v30 = vmax.f32 %v647_v54, %v657_v29  ;;  %v664_v31 = vmax.f32 %v648_v26, %v660_v52  ;;  %v666_v48 = vsel %vm1889_vm5, %v662_v24, %v646_v21  ;;  %vm1895_vm1 = vmmov %vm1893_vm3  ;;  %vm1896_vm5 = vcmp.lt.s32.totalorder %v1177_v43, 16 }
 0x3c4   :  { %671 = vrot.lane.b32.xlu0 %v666_v48, %s1080_s22 }
 0x3c5   :  { %v667_v32 = vsel %vm1890_vm8, %v663_v30, %v647_v54  ;;  %v668_v33 = vsel %vm1891_vm2, %v664_v31, %v648_v26  ;;  %vm1897_vm8 = vmmov %vm1896_vm5 }
 0x3c6   :  { %673 = vrot.lane.b32.xlu1 %v667_v32, %s1080_s22  ;;  %vm1898_vm2 = vmmov %vm1896_vm5 }
 0x3c8   :  { %675 = vrot.lane.b32.xlu0 %v668_v33, %s1080_s22 }
 0x3ca   :  { %689 = vrot.lane.b32.xlu1 %v665_v23, %s1087_s30 }
 0x3cc   :  { %691 = vrot.lane.b32.xlu0 %v666_v48, %s1087_s30 }
 0x3ce   :  { %693 = vrot.lane.b32.xlu1 %v667_v32, %s1087_s30 }
 0x3d0   :  { %695 = vrot.lane.b32.xlu0 %v668_v33, %s1087_s30 }
 0x3d2   :  { %709 = vrot.lane.b32.xlu1 %v665_v23, %s1088_s6 }
 0x3d4   :  { %711 = vrot.lane.b32.xlu0 %v666_v48, %s1088_s6 }
 0x3d6   :  { %713 = vrot.lane.b32.xlu1 %v667_v32, %s1088_s6 }
 0x3d8   :  { %715 = vrot.lane.b32.xlu0 %v668_v33, %s1088_s6 }
 0x3da   :  { %729 = vrot.lane.b32.xlu1 %v665_v23, %s1089_s7 }
 0x3dc   :  { %731 = vrot.lane.b32.xlu0 %v666_v48, %s1089_s7 }
 0x3de   :  { %733 = vrot.lane.b32.xlu1 %v667_v32, %s1089_s7 }
 0x3e0   :  { %735 = vrot.lane.b32.xlu0 %v668_v33, %s1089_s7 }
 0x3e2   :  { %755 = vperm.xlu1 %1009, %v751_v59  }
 0x3e4   :  { %760 = vperm.xlu0 %1008, %v752_v57  }
 0x434   :  { %v670_v61 = vpop.permute.xlu1 %669 }
 0x436   :  { %v672_v35 = vpop.permute.xlu0 %671 }
 0x437   :  { %v679_v58 = vsel %vm1893_vm3, %v670_v61, %v672_v35  ;;  %vm1900_vm3 = vmmov %vm1898_vm2 }
 0x438   :  { %v674_v41 = vpop.permute.xlu1 %673  ;;  %v682_v10 = vmax.f32 %v666_v48, %v679_v58 }
 0x439   :  { %v678_v1 = vsel %vm1894_vm4, %v672_v35, %v674_v41 }
 0x43a   :  { %v676_v42 = vpop.permute.xlu0 %675  ;;  %v683_v12 = vmax.f32 %v667_v32, %v678_v1 }
 0x43b   :  { %v680_v50 = vsel %vm1892_vm7, %v676_v42, %v670_v61  ;;  %v677_v4 = vsel %vm1895_vm1, %v674_v41, %v676_v42  ;;  %vm1899_vm7 = vcmp.lt.s32.totalorder %v1177_v43, 112  ;;  %v749_v43 = vld [vmem:[%s1798_s3] sm:$0xff]  ;;  %s1090_s3 = smov [#allocation5]  }
 0x43c   :  { %v690_v37 = vpop.permute.xlu1 %689  ;;  %v681_v51 = vmax.f32 %v665_v23, %v680_v50  ;;  %v684_v19 = vmax.f32 %v668_v33, %v677_v4  ;;  %vm1901_vm4 = vmmov %vm1899_vm7  ;;  %s977_s15 = sshll.u32 %s1090_s3, 4  ;;  %s978_s15 = int_to_ptr.vmem [resolvable:$true] %s977_s15 }
 0x43d   :  { %vm1903_vm1 = vmmov %vm1901_vm4  ;;  %s1054_s16 = scalar_lea.vmem %s978_s15, 1024  ;;  %p1059_p6 = scmp.lt.s32.totalorder %s978_s15, %s978_s15 }
 0x43e   :  { %v692_v45 = vpop.permute.xlu0 %691  ;;  %v685_v15 = vsel %vm1327_vm9, %v681_v51, %v665_v23  ;;  %v687_v23 = vsel %vm1351_vm14, %v683_v12, %v667_v32  ;;  %vm1902_vm9 = vmmov %vm1901_vm4  ;;  %p1055_p5 = scmp.ne.s32.totalorder %s978_s15, %s1054_s16  ;;  %p1060_p7 = scmp.lt.s32.totalorder %s1054_s16, %s1054_s16 }
 0x43f   :  { %v699_v6 = vsel %vm1896_vm5, %v690_v37, %v692_v45 }
 0x440   :  { %v694_v46 = vpop.permute.xlu1 %693  ;;  %v702_v20 = vmax.f32 %v682_v10, %v699_v6  ;;  %p1061_p8 = por %p1060_p7, %p1059_p6 }
 0x441   :  { %v698_v22 = vsel %vm1900_vm3, %v692_v45, %v694_v46 }
 0x442   :  { %v696_v47 = vpop.permute.xlu0 %695  ;;  %v703_v29 = vmax.f32 %v687_v23, %v698_v22  ;;  %p1062_p9 = pnand %p1061_p8, %p1055_p5 }
 0x443   :  { %v700_v8 = vsel %vm1897_vm8, %v696_v47, %v690_v37  ;;  %v697_v16 = vsel %vm1898_vm2, %v694_v46, %v696_v47 }
 0x444   :  { %v710_v55 = vpop.permute.xlu1 %709  ;;  %v701_v21 = vmax.f32 %v685_v15, %v700_v8  ;;  %v704_v54 = vmax.f32 %v684_v19, %v697_v16  ;;  %v707_v35 = vsel %vm1375_vm12, %v703_v29, %v687_v23 }
 0x446   :  { %v712_v60 = vpop.permute.xlu0 %711  ;;  %v705_v52 = vsel %vm1347_vm15, %v701_v21, %v685_v15 }
 0x447   :  { %v719_v30 = vsel %vm1902_vm9, %v710_v55, %v712_v60 }
 0x448   :  { %v714_v9 = vpop.permute.xlu1 %713  ;;  %v721_v59 = vmax.f32 %v705_v52, %v719_v30 }
 0x449   :  { %v718_v17 = vsel %vm1899_vm7, %v712_v60, %v714_v9 }
 0x44a   :  { %v716_v18 = vpop.permute.xlu0 %715  ;;  %v722_v13 = vmax.f32 %v702_v20, %v718_v17 }
 0x44b   :  { %v720_v24 = vsel %vm1901_vm4, %v716_v18, %v710_v55  ;;  %v717_v33 = vsel %vm1903_vm1, %v714_v9, %v716_v18 }
 0x44c   :  { %v730_v25 = vpop.permute.xlu1 %729  ;;  %v724_v31 = vmax.f32 %v704_v54, %v720_v24  ;;  %v726_v28 = vsel %vm1364_vm0, %v722_v13, %v702_v20  ;;  %v723_v38 = vmax.f32 %v707_v35, %v717_v33 }
 0x44e   :  { %v732_v26 = vpop.permute.xlu0 %731  ;;  %v728_v41 = vsel %vm1393_vm6, %v724_v31, %v704_v54  ;;  %vm763_vm6 = vcmask 261120  }
 0x44f   :  { %v739_v57 = vsel %vm416_vm11, %v730_v25, %v732_v26 }
 0x450   :  { %v734_v48 = vpop.permute.xlu1 %733  ;;  %v741_v45 = vmax.f32 %v721_v59, %v739_v57 }
 0x451   :  { %v738_v32 = vsel %vm416_vm11, %v732_v26, %v734_v48 }
 0x452   :  { %v742_v27 = vmax.f32 %v726_v28, %v738_v32  ;;  %v736_v61 = vpop.permute.xlu0 %735 }
 0x453   :  { %v737_v42 = vsel %vm416_vm11, %v734_v48, %v736_v61  ;;  %v740_v37 = vsel %vm416_vm11, %v736_v61, %v730_v25 }
 0x454   :  { %v744_v46 = vmax.f32 %v728_v41, %v740_v37  ;;  %v746_v47 = vsel %vm1379_vm13, %v742_v27, %v726_v28  ;;  %v743_v50 = vmax.f32 %v723_v38, %v737_v42 }
 0x455   :  { %794 = vmatprep.subr.mxu0 %v746_v47 }
 0x456   :  { %795 = vmatpush1.msra.mxu0 %v741_v45  ;;  %v748_v49 = vsel %vm1405_vm10, %v744_v46, %v728_v41 }
 0x457   :  { %796 = vmatprep.subr.mxu0 %v1583_v56  ;;  %871 = vmatprep.subr.mxu1 %v748_v49 }
 0x458   :  { %797 = vmatpush1.msra.mxu0 %v1571_v44  ;;  %872 = vmatpush1.msra.mxu1 %v743_v50 }
 0x459   :  { %798 = vmatprep.subr.mxu0 %v1401_v5  ;;  %873 = vmatprep.subr.mxu1 %v1597_v3 }
 0x45a   :  { %799 = vmatpush1.msra.mxu0 %v1391_v63  ;;  %874 = vmatpush1.msra.mxu1 %v1591_v62 }
 0x45b   :  { %800 = vmatprep.subr.mxu0 %v1151_v40  ;;  %875 = vmatprep.subr.mxu1 %v1421_v14 }
 0x45c   :  { %801 = vmatpush1.msra.mxu0 %v1137_v34  ;;  %876 = vmatpush1.msra.mxu1 %v1417_v11 }
 0x45d   :  { %991 = vmatmul.mubr.msk.f32.vlgmr.msra.gmra.mxu0 %vm763_vm6, %v749_v43  ;;  %877 = vmatprep.subr.mxu1 %v1145_v39  ;;  %v756_v40 = vpop.permute.xlu1 %755 }
 0x45e   :  { %878 = vmatpush1.msra.mxu1 %v1139_v36  ;;  %840 = vmatprep.mubr.f32.mxu0 %v1081_v0 }
 0x45f   :  { %993 = vmatmul.mubr.msk.f32.vlgmr.msra.gmra.mxu1 %vm763_vm6, %v749_v43  ;;  %v761_v7 = vpop.permute.xlu0 %760 }
 0x460   :  { %917 = vmatprep.mubr.f32.mxu1 %v1081_v0 }
 0x461   :  { %992 = vmatmul.mubr.msk.f32.gmra.mxu0 %vm763_vm6, %v750_v53 }
 0x463   :  { %994 = vmatmul.mubr.msk.f32.gmra.mxu1 %vm763_vm6, %v750_v53 }
 0x51d   :  { %v836_v34 = vpop.f32.mrf.mxu0 }
 0x51e   :  { %v837_v63 = vadd.f32 %v836_v34, %v756_v40 }
 0x51f   :  { %v838_v2 = vpop.f32.mrf.mxu0  ;;  %v913_v5 = vpop.f32.mrf.mxu1 }
 0x520   :  { %v924_v39 = vmul.f32 0.5, %v837_v63  ;;  %v839_v11 = vadd.f32 %v838_v2, %v756_v40  ;;  %v914_v36 = vadd.f32 %v913_v5, %v756_v40 }
 0x521   :  { %v842_v14 = vpop.f32.mrf.mxu0  ;;  %v915_v44 = vpop.f32.mrf.mxu1 }
 0x522   :  { %1018 = vtanh.f32 %v924_v39  ;;  %v925_v56 = vmul.f32 0.5, %v839_v11  ;;  %v926_v62 = vmul.f32 0.5, %v914_v36  ;;  %v843_v3 = vadd.f32 %v842_v14, %v761_v7 }
 0x523   :  { %v916_v55 = vadd.f32 %v915_v44, %v756_v40  ;;  %v844_v58 = vpop.f32.mrf.mxu0  ;;  %v919_v0 = vpop.f32.mrf.mxu1 }
 0x524   :  { %1020 = vtanh.f32 %v925_v56  ;;  %v928_v51 = vmul.f32 0.5, %v843_v3  ;;  %v845_v60 = vadd.f32 %v844_v58, %v761_v7  ;;  %v920_v1 = vadd.f32 %v919_v0, %v761_v7 }
 0x525   :  { %1022 = vtanh.f32 %v926_v62  ;;  %v927_v4 = vmul.f32 0.5, %v916_v55  ;;  %v921_v6 = vpop.f32.mrf.mxu1 }
 0x526   :  { %1024 = vtanh.f32 %v928_v51  ;;  %v929_v8 = vmul.f32 0.5, %v845_v60  ;;  %v930_v9 = vmul.f32 0.5, %v920_v1  ;;  %v922_v10 = vadd.f32 %v921_v6, %v761_v7 }
 0x527   :  { %1026 = vtanh.f32 %v927_v4 }
 0x528   :  { %1028 = vtanh.f32 %v929_v8  ;;  %v931_v12 = vmul.f32 0.5, %v922_v10 }
 0x529   :  { %1030 = vtanh.f32 %v930_v9 }
 0x52a   :  { %1032 = vtanh.f32 %v931_v12 }
 0x52f   :  { %v1019_v15 = vpop.eup %1018 }
 0x530   :  { %v940_v16 = vmul.f32 0.5, %v1019_v15 }
 0x531   :  { %v1021_v17 = vpop.eup %1020 }
 0x532   :  { %v1023_v18 = vpop.eup %1022  ;;  %v948_v19 = vadd.f32 0.5, %v940_v16  ;;  %v941_v20 = vmul.f32 0.5, %v1021_v17 }
 0x533   :  { %v1025_v21 = vpop.eup %1024  ;;  %v942_v22 = vmul.f32 0.5, %v1023_v18 }
 0x534   :  { %v1027_v24 = vpop.eup %1026  ;;  %v956_v25 = vmul.f32 %v948_v19, %v837_v63  ;;  %v949_v54 = vadd.f32 0.5, %v941_v20  ;;  %v944_v13 = vmul.f32 0.5, %v1025_v21 }
 0x535   :  { %v1029_v23 = vpop.eup %1028  ;;  %v950_v26 = vadd.f32 0.5, %v942_v22  ;;  %v943_v29 = vmul.f32 0.5, %v1027_v24 }
 0x536   :  { %v1031_v52 = vpop.eup %1030  ;;  %964 = vst [vmem:[#allocation5] sm:$0xff] %v956_v25  ;;  %v957_v30 = vmul.f32 %v949_v54, %v839_v11  ;;  %v952_v31 = vadd.f32 0.5, %v944_v13  ;;  %v945_v48 = vmul.f32 0.5, %v1029_v23 }
 0x537   :  { %v1033_v33 = vpop.eup %1032  ;;  %v958_v57 = vmul.f32 %v950_v26, %v914_v36  ;;  %v951_v28 = vadd.f32 0.5, %v943_v29  ;;  %v946_v32 = vmul.f32 0.5, %v1031_v52 }
 0x538   :  { %965 = vst [vmem:[#allocation5 + $0x8] sm:$0xff] %v957_v30  ;;  %v960_v59 = vmul.f32 %v952_v31, %v843_v3  ;;  %v953_v27 = vadd.f32 0.5, %v945_v48  ;;  %v947_v61 = vmul.f32 0.5, %v1033_v33 }
 0x539   :  { %966 = vst [vmem:[#allocation5 + $0x10] sm:$0xff] %v958_v57  ;;  %v959_v35 = vmul.f32 %v951_v28, %v916_v55  ;;  %v954_v41 = vadd.f32 0.5, %v946_v32 }
 0x53a   :  { %968 = vst [vmem:[#allocation5 + $0x20] sm:$0xff] %v960_v59  ;;  %v961_v42 = vmul.f32 %v953_v27, %v845_v60  ;;  %v955_v37 = vadd.f32 0.5, %v947_v61 }
 0x53b   :  { %967 = vst [vmem:[#allocation5 + $0x18] sm:$0xff] %v959_v35  ;;  %v962_v38 = vmul.f32 %v954_v41, %v920_v1 }
 0x53c   :  { %969 = vst [vmem:[#allocation5 + $0x28] sm:$0xff] %v961_v42  ;;  %v963_v45 = vmul.f32 %v955_v37, %v922_v10 }
 0x53d   :  { %970 = vst [vmem:[#allocation5 + $0x30] sm:$0xff] %v962_v38 }
 0x53e   :  { %971 = vst [vmem:[#allocation5 + $0x38] sm:$0xff] %v963_v45 }
 0x53f   :  { %1065 = shalt.err (!%p1062_p9)
}
 0x540   :  { %983 = dma.vmem_to_hbm [thread:$0]  %s978_s15, 1024, %s1800_s5, [#allocation4], %s1079_s21, %s1079_s21, %s1080_s22  }
 0x541   :  { %1076 = dma.done.wait [#allocation4], 1024  }
 0x542   :  { %1077 = vsyncadd [#allocation4], 4294966272 }
 0x543   :  { %987 = vsyncpa [#allocation3], 1 }
 0x544   :  { %988 = vsyncpa [#allocation4], 1 }

</bundles_post_ra>
